<compile_context>
chip_gen: v5e
topology: v5e:2x2
jax: 0.10.0
libtpu: 0.0.40
codegen_flags: <defaults>
</compile_context>

<pallas_src>
import math

import jax
import jax.numpy as jnp
from jax.experimental import pallas as pl
from jax.experimental.pallas import tpu as pltpu


# ----------------------------------------------------------------------------
# Kernel: lane-dense identity copy of one 2-D tile of the flat view.
# ----------------------------------------------------------------------------

def _copy_kernel(x_ref, o_ref):
    o_ref[...] = x_ref[...]


# ----------------------------------------------------------------------------
# Tiling plan
# ----------------------------------------------------------------------------

_TARGET_BLOCK_BYTES = 2 << 20   # ~2 MiB per block; x4 live buffers ~= 8 MiB VMEM
_MAX_LANES = 1024               # lane width of the flat view (multiple of 128)


def _cdiv(a, b):
    return (a + b - 1) // b


def _round_up(a, m):
    return _cdiv(a, m) * m


def _plan_flat_copy(total, itemsize):
    """Pick a free 2-D flat view + lane-dense blocks for the identity copy.

    Returns (view_shape, block_shape, grid, index_map).
    """
    if total % 128 == 0:
        # Main path: view as (R, K) with K a multiple of 128 -> every store is
        # an unmasked, lane-dense vst and rows pack sublanes densely.
        K = 128
        while (K * 2 <= _MAX_LANES and total % (K * 2) == 0
               and total // (K * 2) >= 16):
            K *= 2
        R = total // K
        # Row tile by byte budget, multiple of 8 sublanes.
        rt = _TARGET_BLOCK_BYTES // (K * itemsize)
        rt = max(8, (rt // 8) * 8)
        if R >= 16:
            # Guarantee >= 2 grid steps so both v7x TensorCores get work.
            rt = min(rt, max(8, (_cdiv(R, 2) // 8) * 8))
        rt = min(rt, R)
        if rt != R and rt % 8 != 0:
            rt = R  # block sublane dim must be a multiple of 8 or the full dim
        return (R, K), (rt, K), (_cdiv(R, rt),), (lambda i: (i, 0))

    # Fallback (element count not 128-aligned): (1, total) view, lane-dense
    # blocks (multiple of 128) with a single masked edge block.  Byte-budget
    # bounded so large unaligned shapes never blow the scoped VMEM limit.
    if total <= 128:
        kb = total                      # one tiny full-extent block
    else:
        kb = (_TARGET_BLOCK_BYTES // itemsize // 128) * 128
        kb = min(kb, _round_up(total, 128))
        if total > 256:
            # Keep >= 2 lane-dense steps when possible (v7x megacore).
            kb = min(kb, _round_up(_cdiv(total, 2), 128))
        kb = max(kb, 128)
    return (1, total), (1, kb), (_cdiv(total, kb),), (lambda i: (0, i))


# ----------------------------------------------------------------------------
# Wrappers
# ----------------------------------------------------------------------------

def flatten_view(x):
    """Zero-cost equivalent of `x.view(B, C, -1)` (pure metadata reshape)."""
    return jnp.reshape(x, (x.shape[0], x.shape[1], -1))


def flatten(x):
    """Pallas materialization of `x.view(x.shape[0], x.shape[1], -1)`."""
    B, C = x.shape[0], x.shape[1]
    L = math.prod(x.shape[2:]) if len(x.shape) > 2 else 1
    total = B * C * L
    itemsize = jnp.dtype(x.dtype).itemsize

    view, block, grid, index_map = _plan_flat_copy(total, itemsize)

    # Free trace-level rank collapse into the lane-dense flat view.
    x_flat = jnp.reshape(x, view)

    out_flat = pl.pallas_call(
        _copy_kernel,
        grid=grid,
        in_specs=[pl.BlockSpec(block, index_map)],
        out_specs=pl.BlockSpec(block, index_map),
        out_shape=jax.ShapeDtypeStruct(view, x.dtype),
        compiler_params=pltpu.CompilerParams(
            dimension_semantics=("parallel",)),
    )(x_flat)

    # Free trace-level reshape back to the PyTorch output shape.
    return jnp.reshape(out_flat, (B, C, L))


# ----------------------------------------------------------------------------
# Demo / self-check
# ----------------------------------------------------------------------------

if __name__ == "__main__":
    key = jax.random.PRNGKey(0)
    k1, k2 = jax.random.split(key)

    # Case 1: 128-aligned flattened length (batch=2, channels=4, 16x16).
    x = jax.random.normal(k1, (2, 4, 16, 16), jnp.float32)
    y = jax.jit(flatten)(x)
    jax.block_until_ready(y)
    assert y.shape == (2, 4, 256), y.shape
    assert y.dtype == x.dtype
    assert bool(jnp.array_equal(y, flatten_view(x)))
    assert bool(jnp.array_equal(y, x.reshape(2, 4, -1)))

    # Case 2: non-128-aligned element count (exercises the masked-edge
    # lane-dense fallback).
    x2 = jax.random.normal(k2, (3, 8, 5, 7), jnp.float32)
    y2 = jax.jit(flatten)(x2)
    jax.block_until_ready(y2)
    assert y2.shape == (3, 8, 35), y2.shape
    assert bool(jnp.array_equal(y2, x2.reshape(3, 8, -1)))

    print("KERNEL_OK")
</pallas_src>

<mosaic_0001>
module attributes {stable_mosaic.version = 11 : i64} {
  func.func @_copy_kernel(%arg0: i32, %arg1: memref<8x128xf32, #tpu.memory_space<vmem>>, %arg2: memref<8x128xf32, #tpu.memory_space<vmem>>) attributes {dimension_semantics = [#tpu.dimension_semantics<parallel>], iteration_bounds = array<i64: 2>, scalar_prefetch = 0 : i64, scratch_operands = 0 : i64, tpu.core_type = #tpu.core_type<tc>, window_params = [{transform_indices = @transform_0, window_bounds = array<i64: 8, 128>}, {transform_indices = @transform_1, window_bounds = array<i64: 8, 128>}]} {
    %c0 = arith.constant 0 : index
    %c0_0 = arith.constant 0 : index
    %0 = vector.load %arg1[%c0, %c0_0] : memref<8x128xf32, #tpu.memory_space<vmem>>, vector<8x128xf32>
    %c0_1 = arith.constant 0 : index
    %c0_2 = arith.constant 0 : index
    %1 = vector.load %arg2[%c0_1, %c0_2] : memref<8x128xf32, #tpu.memory_space<vmem>>, vector<8x128xf32>
    tpu.vector_store %arg2[%c0_1, %c0_2], %0 {strides = array<i32>} : memref<8x128xf32, #tpu.memory_space<vmem>>, vector<8x128xf32>,
    return
  }
  func.func @transform_0(%arg0: i32) -> (i32, i32) {
    %c0_i32 = arith.constant 0 : i32
    %c0_i32_0 = arith.constant 0 : i32
    return %arg0, %c0_i32 : i32, i32
  }
  func.func @transform_1(%arg0: i32) -> (i32, i32) {
    %c0_i32 = arith.constant 0 : i32
    %c0_i32_0 = arith.constant 0 : i32
    return %arg0, %c0_i32 : i32, i32
  }
}

</mosaic_0001>

<bundles_post_ra>
// kernel: flatten.1
= control target key start
LH: loop header
LB: loop body
LE: loop exit
PB: predicated region body
PF: predicated region fallthrough
CT: control target
= control target key end

     0   :  { %s188_s6 = smov 0   ;;  %s208_s0 = inlined_call_operand.vmem [shape: f32[16,128], index: 0, kind: input, shape index: {}]   ;;  %s209_s1 = inlined_call_operand.vmem [shape: f32[16,128], index: 1, kind: output, shape index: {}]  }
   0x1 LB: > { %s167_s7 = sadd.s32 4294967295, %s190_s6   ;;  %p171_p0 = scmp.ge.s32.totalorder %s190_s6, 1  ;;  %s190_s6 = sphi %s188_s6, %s11_s6  }
   0x2   : > { %p86_p1 = scmp.lt.s32.totalorder %s190_s6, 3 }
   0x4   : > { %p87_p2 = pnand %p171_p0, %p86_p1 }
   0x5   : > { %p104_p3 = scmp.lt.s32.totalorder (!%p87_p2), %s167_s7, 1 }
   0x6   : > { %90 = sbr.rel (%p87_p2) target bundleno = 16 (0x10), region = 24 }
   0xb   : > { %s211_s7 = smov (!%p104_p3, %s167_s7), 1 }
   0xc   : > { %s172_s8 = sshll.u32 %s211_s7, 3 }
   0xd   : > { %s107_s11 = scalar_lea.vmem %s208_s0, %s172_s8  ;;  %s111_s14 = scalar_lea.vmem %s209_s1, %s172_s8 }
   0xe   : > { %v112_v0 = vld [vmem:[%s107_s11] sm:$0xff] }
   0xf   : > { %113 = vst [vmem:[%s111_s14] sm:$0xff] %v112_v0 }
  0x10 PF: > { %s11_s6 = sadd.s32 1, %s190_s6  }
  0x11   : > { %p8_p4 = scmp.ge.s32.totalorder %s11_s6, 4  }
  0x13   :  { %10 = sbr.rel (!%p8_p4) target bundleno = 1 (0x1), region = 54 }

</bundles_post_ra>
